<compile_context>
chip_gen: v5e
topology: v5e:2x2
jax: 0.10.0
libtpu: 0.0.40
codegen_flags: <defaults>
</compile_context>

<pallas_src>
import jax
import jax.numpy as jnp
from jax.experimental import pallas as pl
from jax.experimental.pallas import tpu as pltpu


def _round_up(x, m):
    return ((x + m - 1) // m) * m


def _make_kernel(n_features):
    def kernel(params_ref, x_ref, o_ref):
        # params_ref: SMEM [F+1] f32 -> w_0 .. w_{F-1}, bias
        # x_ref:      VMEM [F, R, 128]   batch dense on sublanes x lanes
        # o_ref:      VMEM [R, 128]      batch dense on sublanes x lanes
        z = x_ref[0] * params_ref[0]                      # VPU
        for j in range(1, n_features):
            z = z + x_ref[j] * params_ref[j]              # VPU
        z = z + params_ref[n_features]                    # bias (SMEM scalar)
        # Exact sigmoid: one EUP tanh, no approx-reciprocal error.
        o_ref[...] = (0.5 * jnp.tanh(0.5 * z) + 0.5).astype(o_ref.dtype)
    return kernel


def binary_classifier_forward(x, weight, bias, *, tile_n=262144,
                              min_pallas_batch=8192, feature_major=False):
    """sigmoid(x @ weight.T + bias).

    x: [N, F] f32 (or [F, N] if feature_major=True)
    weight: [1, F] f32 (PyTorch nn.Linear layout), bias: [1] f32
    returns [N, 1] f32
    """
    if feature_major:
        f, n = x.shape
    else:
        n, f = x.shape
    o = weight.shape[0]
    assert o == 1, "BinaryClassifier has a single output unit"
    assert weight.shape[1] == f

    # ---- small-batch fast path: XLA fusion beats any kernel launch here ----
    if n < min_pallas_batch:
        x_nf = x.T if feature_major else x
        return jax.nn.sigmoid(x_nf @ weight.T + bias)

    # ---- Pallas path: lane+sublane dense batch layout ----
    n_pad = _round_up(n, 128)
    n_rows = n_pad // 128

    if feature_major:
        xf = x                                            # already [F, N]
    else:
        xf = x.T                                          # [F, N]; fuses with pad/reshape into one copy
    if n_pad != n:
        xf = jnp.pad(xf, ((0, 0), (0, n_pad - n)))
    x3 = xf.reshape(f, n_rows, 128)                       # [F, R_total, 128]

    # rows per grid step: multiple of 8 (dense sublanes), big enough to
    # amortize per-step overhead, small enough for v7x VMEM.
    rows_tile = _round_up(max(tile_n // 128, 8), 8)
    if rows_tile >= n_rows:
        rows_tile = n_rows                                # single full block
    grid = (pl.cdiv(n_rows, rows_tile),)                  # partial last block OK

    # Weights + bias as SMEM scalars: no VMEM block, no per-tile broadcast DMA.
    params = jnp.concatenate(
        [weight.reshape(-1), bias.reshape(-1)]).astype(jnp.float32)

    out = pl.pallas_call(
        _make_kernel(f),
        out_shape=jax.ShapeDtypeStruct((n_rows, 128), jnp.float32),
        grid=grid,
        in_specs=[
            pl.BlockSpec(memory_space=pltpu.MemorySpace.SMEM),      # params, untiled
            pl.BlockSpec((f, rows_tile, 128), lambda i: (0, i, 0)),  # x tile
        ],
        out_specs=pl.BlockSpec((rows_tile, 128), lambda i: (i, 0)),  # o tile
        compiler_params=pltpu.CompilerParams(
            dimension_semantics=("parallel",)),
    )(params, x3)

    return out.reshape(n_pad)[:n].reshape(n, o)


if __name__ == "__main__":
    key = jax.random.PRNGKey(0)
    kx, kw, kb = jax.random.split(key, 3)

    # Shapes implied by the module: features=2, out=1; batch=8.
    batch, in_features, out_features = 8, 2, 1
    x = jax.random.normal(kx, (batch, in_features), dtype=jnp.float32)

    # Deterministic init mimicking nn.Linear's default U(-1/sqrt(fan_in), 1/sqrt(fan_in)).
    bound = 1.0 / jnp.sqrt(jnp.float32(in_features))
    weight = jax.random.uniform(kw, (out_features, in_features),
                                minval=-bound, maxval=bound, dtype=jnp.float32)
    bias = jax.random.uniform(kb, (out_features,),
                              minval=-bound, maxval=bound, dtype=jnp.float32)

    ref = jax.nn.sigmoid(x @ weight.T + bias)

    # 1) Force the Pallas kernel even at batch=8 (exercises the kernel path).
    out_k = jax.block_until_ready(
        binary_classifier_forward(x, weight, bias, min_pallas_batch=0))
    assert out_k.shape == (batch, out_features)
    assert jnp.allclose(out_k, ref, atol=1e-4, rtol=0)

    # 2) Default call at batch=8 takes the small-batch fast path.
    out_fast = jax.block_until_ready(binary_classifier_forward(x, weight, bias))
    assert out_fast.shape == (batch, out_features)
    assert jnp.allclose(out_fast, ref, atol=1e-4, rtol=0)

    # 3) Larger batch through the kernel: exercises 128-padding, a multi-step
    #    "parallel" grid, and a partial last block (79 rows, rows_tile=8).
    x_big = jax.random.normal(jax.random.PRNGKey(1), (10000, in_features),
                              dtype=jnp.float32)
    out_big = jax.block_until_ready(
        binary_classifier_forward(x_big, weight, bias,
                                  tile_n=1024, min_pallas_batch=0))
    ref_big = jax.nn.sigmoid(x_big @ weight.T + bias)
    assert out_big.shape == (10000, out_features)
    assert jnp.allclose(out_big, ref_big, atol=1e-4, rtol=0)

    print("KERNEL_OK")
</pallas_src>

<mosaic_0001>
module attributes {stable_mosaic.version = 11 : i64} {
  func.func @kernel(%arg0: i32, %arg1: memref<3xf32, #tpu.memory_space<smem>>, %arg2: memref<2x1x128xf32, #tpu.memory_space<vmem>>, %arg3: memref<1x128xf32, #tpu.memory_space<vmem>>) attributes {dimension_semantics = [#tpu.dimension_semantics<parallel>], iteration_bounds = array<i64: 1>, scalar_prefetch = 0 : i64, scratch_operands = 0 : i64, tpu.core_type = #tpu.core_type<tc>, window_params = [{transform_indices = @transform_0, window_bounds = array<i64: 3>}, {transform_indices = @transform_1, window_bounds = array<i64: 2, 1, 128>}, {transform_indices = @transform_2, window_bounds = array<i64: 1, 128>}]} {
    %c0 = arith.constant 0 : index
    %c0_0 = arith.constant 0 : index
    %c0_1 = arith.constant 0 : index
    %0 = vector.load %arg2[%c0, %c0_0, %c0_1] : memref<2x1x128xf32, #tpu.memory_space<vmem>>, vector<1x1x128xf32>
    %1 = vector.shape_cast %0 : vector<1x1x128xf32> to vector<1x128xf32>
    %c0_2 = arith.constant 0 : index
    %2 = memref.load %arg1[%c0_2] : memref<3xf32, #tpu.memory_space<smem>>
    %3 = vector.broadcast %2 : f32 to vector<1x128xf32>
    %4 = arith.mulf %1, %3 : vector<1x128xf32>
    %c1 = arith.constant 1 : index
    %c0_3 = arith.constant 0 : index
    %c0_4 = arith.constant 0 : index
    %5 = vector.load %arg2[%c1, %c0_3, %c0_4] : memref<2x1x128xf32, #tpu.memory_space<vmem>>, vector<1x1x128xf32>
    %6 = vector.shape_cast %5 : vector<1x1x128xf32> to vector<1x128xf32>
    %c1_5 = arith.constant 1 : index
    %7 = memref.load %arg1[%c1_5] : memref<3xf32, #tpu.memory_space<smem>>
    %8 = vector.broadcast %7 : f32 to vector<1x128xf32>
    %9 = arith.mulf %6, %8 : vector<1x128xf32>
    %10 = arith.addf %4, %9 : vector<1x128xf32>
    %c2 = arith.constant 2 : index
    %11 = memref.load %arg1[%c2] : memref<3xf32, #tpu.memory_space<smem>>
    %12 = vector.broadcast %11 : f32 to vector<1x128xf32>
    %13 = arith.addf %10, %12 : vector<1x128xf32>
    %cst = arith.constant 5.000000e-01 : f32
    %14 = vector.broadcast %cst : f32 to vector<1x128xf32>
    %15 = arith.mulf %14, %13 : vector<1x128xf32>
    %16 = math.tanh %15 : vector<1x128xf32>
    %cst_6 = arith.constant 5.000000e-01 : f32
    %17 = vector.broadcast %cst_6 : f32 to vector<1x128xf32>
    %18 = arith.mulf %17, %16 : vector<1x128xf32>
    %cst_7 = arith.constant 5.000000e-01 : f32
    %19 = vector.broadcast %cst_7 : f32 to vector<1x128xf32>
    %20 = arith.addf %18, %19 : vector<1x128xf32>
    %c0_8 = arith.constant 0 : index
    %c0_9 = arith.constant 0 : index
    %21 = vector.load %arg3[%c0_8, %c0_9] : memref<1x128xf32, #tpu.memory_space<vmem>>, vector<1x128xf32>
    tpu.vector_store %arg3[%c0_8, %c0_9], %20 {strides = array<i32>} : memref<1x128xf32, #tpu.memory_space<vmem>>, vector<1x128xf32>,
    return
  }
  func.func @transform_0(%arg0: i32) -> i32 {
    %c0_i32 = arith.constant 0 : i32
    %c0_i32_0 = arith.constant 0 : i32
    return %c0_i32 : i32
  }
  func.func @transform_1(%arg0: i32) -> (i32, i32, i32) {
    %c0_i32 = arith.constant 0 : i32
    %c0_i32_0 = arith.constant 0 : i32
    %c0_i32_1 = arith.constant 0 : i32
    return %c0_i32, %arg0, %c0_i32_0 : i32, i32, i32
  }
  func.func @transform_2(%arg0: i32) -> (i32, i32) {
    %c0_i32 = arith.constant 0 : i32
    %c0_i32_0 = arith.constant 0 : i32
    return %arg0, %c0_i32 : i32, i32
  }
}

</mosaic_0001>

<bundles_post_ra>
// kernel: tpu_custom_call.1
= control target key start
LH: loop header
LB: loop body
LE: loop exit
PB: predicated region body
PF: predicated region fallthrough
CT: control target
= control target key end

     0   :  { %7 = vsyncpa [#allocation5], 0  ;;  %s181_s0 = inlined_call_operand.hbm [shape: f32[3], index: 0, kind: input, shape index: {}]   ;;  %s182_s1 = inlined_call_operand.hbm [shape: f32[2,1,128], index: 1, kind: input, shape index: {}]   ;;  %s183_s2 = inlined_call_operand.hbm [shape: f32[1,128], index: 2, kind: output, shape index: {}]  }
   0x1   :  { %8 = vsyncpa [#allocation3], 0 }
   0x2   :  { %9 = vsyncpa [#allocation4], 0  ;;  %s15_s11 = sshll.u32 %s181_s0, 4  ;;  %s23_s14 = sshll.u32 %s182_s1, 4  ;;  %s16_s11 = int_to_ptr.hbm [resolvable:$true] %s15_s11  ;;  %s24_s14 = int_to_ptr.hbm [resolvable:$true] %s23_s14 }
   0x3   :  { %s152_s15 = smov [#allocation2]   ;;  %s153_s16 = smov [#allocation6]  }
   0x4   :  { %18 = dma.hbm_to_smem %s16_s11, 16, %s152_s15, [#allocation5]  }
   0x5   :  { %s25_s17 = sshll.u32 %s153_s16, 4  ;;  %s154_s18 = smov 16   ;;  %s26_s17 = int_to_ptr.vmem [resolvable:$true] %s25_s17 }
   0x6   :  { %s155_s19 = smov 1  }
   0x7   :  { %31 = dma.hbm_to_vmem [thread:$0]  %s24_s14, 32, %s26_s17, [#allocation3], %s154_s18, %s154_s18, %s155_s19  }
   0x8   :  { %146 = dma.done.wait [#allocation5], 16  }
   0x9   :  { %147 = vsyncadd [#allocation5], 4294967280 }
   0xa   :  { %148 = dma.done.wait [#allocation3], 32  }
   0xb   :  { %149 = vsyncadd [#allocation3], 4294967264 }
   0xc   :  { %40 = sfence }
   0xd   :  { %s42_s0 = sld [smem:[#allocation2]]  ;;  %v41_v0 = vld [vmem:[#allocation6] sm:$0x1]  ;;  %v46_v1 = vld [vmem:[#allocation6 + $0x1] sm:$0x1]  ;;  %s156_s1 = smov [#allocation7]  }
   0xe   :  { %s77_s20 = sld [smem:[#allocation2 + $0x1]]  ;;  %s64_s22 = sshll.u32 %s156_s1, 4  ;;  %s65_s22 = int_to_ptr.vmem [resolvable:$true] %s64_s22 }
   0xf   :  { %s78_s21 = sld [smem:[#allocation2 + $0x2]]  ;;  %s66_s25 = sshll.u32 %s183_s2, 4  ;;  %s67_s25 = int_to_ptr.hbm [resolvable:$true] %s66_s25 }
  0x13   :  { %v43_v2 = vstv %s42_s0 }
  0x14   :  { %v44_v3 = vmul.f32 %v43_v2, %v41_v0  ;;  %v48_v4 = vstv %s77_s20 }
  0x15   :  { %v49_v5 = vmul.f32 %v48_v4, %v46_v1  ;;  %v52_v6 = vstv %s78_s21 }
  0x17   :  { %v50_v7 = vadd.f32 %v49_v5, %v44_v3 }
  0x19   :  { %v53_v8 = vadd.f32 %v52_v6, %v50_v7 }
  0x1b   :  { %v54_v9 = vmul.f32 0.5, %v53_v8 }
  0x1d   :  { %84 = vtanh.f32 %v54_v9 }
  0x23   :  { %v85_v10 = vpop.eup %84 }
  0x24   :  { %v56_v11 = vmul.f32 0.5, %v85_v10 }
  0x26   :  { %v57_v12 = vadd.f32 0.5, %v56_v11 }
  0x28   :  { %58 = vst [vmem:[#allocation7] sm:$0x1] %v57_v12 }
  0x29   :  { %69 = dma.vmem_to_hbm [thread:$0]  %s65_s22, 16, %s67_s25, [#allocation4]  }
  0x2a   :  { %150 = dma.done.wait [#allocation4], 16  }
  0x2b   :  { %151 = vsyncadd [#allocation4], 4294967280 }
  0x2c   :  { %74 = vsyncpa [#allocation3], 1 }
  0x2d   :  { %75 = vsyncpa [#allocation4], 1 }
  0x2e   :  { %76 = vsyncpa [#allocation5], 1 }

</bundles_post_ra>
